<compile_context>
chip_gen: v5e
topology: v5e:2x2
jax: 0.10.0
libtpu: 0.0.40
codegen_flags: <defaults>
</compile_context>

<pallas_src>
import functools

import jax
import jax.numpy as jnp
from jax import lax
from jax.experimental import pallas as pl
from jax.experimental.pallas import tpu as pltpu


_LANE = 128          # TPU lane width (last dim)
_ROW_ALIGN = 16      # sublane alignment (covers bf16 packing and f32)
_MAX_TILE_ROWS = 1024


def _round_up(x: int, m: int) -> int:
    return ((x + m - 1) // m) * m


def _vmem_budget_and_limit():
    """Per-step working-set budget and scoped-VMEM limit, per TPU generation."""
    try:
        cap = int(pltpu.get_tpu_info().vmem_capacity_bytes)
    except Exception:
        cap = 64 * 1024 * 1024  # be conservative if the query is unavailable
    if cap >= 128 * 1024 * 1024:          # v5e / v6e (128 MiB VMEM)
        return 72 * 1024 * 1024, 100 * 1024 * 1024
    return 24 * 1024 * 1024, 48 * 1024 * 1024   # v7x (64 MiB) or unknown


# ----------------------------------------------------------------------------
# Single-pass kernel: whole vocab row resident in VMEM.
# ----------------------------------------------------------------------------
def _softmax_kernel(x_ref, o_ref, *, log_probs: bool):
    x = x_ref[...]
    # max is exact in the native dtype (bf16 or f32); cast once for the sub.
    m = jnp.max(x, axis=-1, keepdims=True).astype(jnp.float32)
    shifted = x.astype(jnp.float32) - m          # matches .float() in torch
    e = jnp.exp(shifted)
    s = jnp.sum(e, axis=-1, keepdims=True)
    if log_probs:
        o_ref[...] = shifted - jnp.log(s)        # log_softmax
    else:
        o_ref[...] = e / s                       # exact divide (HBM-bound anyway)


def _single_pass(x2d, R, V, bytes_per_row, budget, vmem_limit, log_probs):
    tile_rows = (budget // bytes_per_row) // _ROW_ALIGN * _ROW_ALIGN
    tile_rows = max(_ROW_ALIGN, min(tile_rows, _MAX_TILE_ROWS))
    if R > _ROW_ALIGN:
        # Guarantee >= 2 grid steps so both v7x TensorCores get work.
        tile_rows = min(tile_rows, _round_up(-(-R // 2), _ROW_ALIGN))
    if tile_rows >= R:
        tile_rows = R  # single full-extent block (full-dim exception)
    grid = (pl.cdiv(R, tile_rows),)

    kernel = functools.partial(_softmax_kernel, log_probs=log_probs)
    return pl.pallas_call(
        kernel,
        out_shape=jax.ShapeDtypeStruct((R, V), jnp.float32),
        grid_spec=pltpu.PrefetchScalarGridSpec(
            num_scalar_prefetch=0,
            grid=grid,
            in_specs=[pl.BlockSpec((tile_rows, V), lambda i: (i, 0))],
            out_specs=pl.BlockSpec((tile_rows, V), lambda i: (i, 0)),
        ),
        compiler_params=pltpu.CompilerParams(
            dimension_semantics=("parallel",),
            vmem_limit_bytes=vmem_limit,
        ),
    )(x2d)


# ----------------------------------------------------------------------------
# Two-pass V-split (huge vocab): online logsumexp, then apply.
# ----------------------------------------------------------------------------
def _lse_kernel(x_ref, lse_ref, m_sc, l_sc, *, v_total: int, tile_v: int):
    j = pl.program_id(1)

    @pl.when(j == 0)
    def _():
        m_sc[...] = jnp.full_like(m_sc, -jnp.inf)
        l_sc[...] = jnp.zeros_like(l_sc)

    x = x_ref[...].astype(jnp.float32)
    # Mask out-of-bounds lanes of the (possibly partial) last vocab tile so
    # garbage lanes cannot contaminate the row max / sum.
    col0 = j * tile_v
    lane = lax.broadcasted_iota(jnp.int32, x.shape, 1)
    x = jnp.where(lane < (v_total - col0), x, -jnp.inf)

    m_old = m_sc[...]
    m_new = jnp.maximum(m_old, jnp.max(x, axis=-1, keepdims=True))
    l_sc[...] = l_sc[...] * jnp.exp(m_old - m_new) + jnp.sum(
        jnp.exp(x - m_new), axis=-1, keepdims=True)
    m_sc[...] = m_new

    @pl.when(j == pl.num_programs(1) - 1)
    def _():
        lse_ref[...] = m_sc[...] + jnp.log(l_sc[...])


def _apply_kernel(x_ref, lse_ref, o_ref, *, log_probs: bool):
    y = x_ref[...].astype(jnp.float32) - lse_ref[...]
    o_ref[...] = y if log_probs else jnp.exp(y)


def _two_pass_vsplit(x2d, R, V, in_bytes, budget, vmem_limit, log_probs,
                     tile_v_override=None):
    if R <= _ROW_ALIGN:
        tile_rows = R
    else:
        tile_rows = min(256, _round_up(-(-R // 2), _ROW_ALIGN))

    per_elem = 2 * in_bytes + 2 * 4 + 2 * 4   # 2x in + 2x out + ~2 f32 temps
    tile_v = budget // (max(tile_rows, _ROW_ALIGN) * per_elem)
    tile_v = max(_LANE, (tile_v // _LANE) * _LANE)
    if tile_v_override is not None:
        tile_v = tile_v_override
    if tile_v >= V:
        tile_v = V          # full-dim exception; single vocab tile

    grid = (pl.cdiv(R, tile_rows), pl.cdiv(V, tile_v))

    # Pass 1: per-row logsumexp via online accumulation over vocab tiles.
    stats_kernel = functools.partial(_lse_kernel, v_total=V, tile_v=tile_v)
    lse = pl.pallas_call(
        stats_kernel,
        out_shape=jax.ShapeDtypeStruct((R, 1), jnp.float32),
        grid_spec=pltpu.PrefetchScalarGridSpec(
            num_scalar_prefetch=0,
            grid=grid,
            in_specs=[pl.BlockSpec((tile_rows, tile_v), lambda i, j: (i, j))],
            out_specs=pl.BlockSpec((tile_rows, 1), lambda i, j: (i, 0)),
            scratch_shapes=[pltpu.VMEM((tile_rows, 1), jnp.float32),
                            pltpu.VMEM((tile_rows, 1), jnp.float32)],
        ),
        compiler_params=pltpu.CompilerParams(
            dimension_semantics=("parallel", "arbitrary"),
            vmem_limit_bytes=vmem_limit,
        ),
    )(x2d)

    # Pass 2: out = x - lse (log) or exp(x - lse) (softmax).
    apply_kernel = functools.partial(_apply_kernel, log_probs=log_probs)
    return pl.pallas_call(
        apply_kernel,
        out_shape=jax.ShapeDtypeStruct((R, V), jnp.float32),
        grid_spec=pltpu.PrefetchScalarGridSpec(
            num_scalar_prefetch=0,
            grid=grid,
            in_specs=[pl.BlockSpec((tile_rows, tile_v), lambda i, j: (i, j)),
                      pl.BlockSpec((tile_rows, 1), lambda i, j: (i, 0))],
            out_specs=pl.BlockSpec((tile_rows, tile_v), lambda i, j: (i, j)),
        ),
        compiler_params=pltpu.CompilerParams(
            dimension_semantics=("parallel", "parallel"),
            vmem_limit_bytes=vmem_limit,
        ),
    )(x2d, lse)


# ----------------------------------------------------------------------------
# Public wrapper.
# ----------------------------------------------------------------------------
def pallas_normalized_probs(logits: jax.Array, log_probs: bool, *,
                            _force_v_split: bool = False,
                            _force_tile_v=None) -> jax.Array:
    """Row-wise (log_)softmax over the last dim, computed in float32."""
    orig_shape = logits.shape
    V = orig_shape[-1]
    x2d = logits.reshape(-1, V)
    R = x2d.shape[0]
    in_bytes = jnp.dtype(logits.dtype).itemsize

    budget, vmem_limit = _vmem_budget_and_limit()

    # Per-row working set: double-buffered input + double-buffered f32 output
    # + ~2 full-tile f32 temporaries.
    bytes_per_row = V * (2 * in_bytes + 2 * 4 + 2 * 4)
    min_rows = R if R <= _ROW_ALIGN else _ROW_ALIGN
    single_pass_ok = (min_rows * bytes_per_row <= budget) and not _force_v_split

    if single_pass_ok:
        out = _single_pass(x2d, R, V, bytes_per_row, budget, vmem_limit, log_probs)
    else:
        out = _two_pass_vsplit(x2d, R, V, in_bytes, budget, vmem_limit, log_probs,
                               tile_v_override=_force_tile_v)
    return out.reshape(orig_shape)


class FakeEncoderModel:
    """JAX port of examples/speech_recognition/criterions/ctc_multi_loss.FakeEncoderModel."""

    def __init__(self, encoder, net_out, target):
        self.net_out = net_out
        self.target = target
        if hasattr(encoder, "output_batch_first"):
            self.output_batch_first = encoder.output_batch_first

    def forward(self, **unused):
        # Pure passthrough, exactly like the PyTorch module.
        return self.net_out

    def get_targets(self, *unused):
        return self.target

    def get_normalized_probs(self, net_output, log_probs, sample=None):
        encoder_out = net_output["encoder_out"]
        if isinstance(encoder_out, jax.Array):
            probs = pallas_normalized_probs(encoder_out, log_probs)
            # TODO(synk): `probs.batch_first = self.output_batch_first` attribute
            # tagging has no JAX-array equivalent (jax.Array is immutable); dropped.
            return probs
        raise NotImplementedError


class _DummyEncoder:
    output_batch_first = False


if __name__ == "__main__":
    key = jax.random.PRNGKey(0)
    T, B, V = 8, 2, 32  # seq, batch, vocab (fairseq time-major layout)
    k1, k2 = jax.random.split(key)
    encoder_out = jax.random.normal(k1, (T, B, V), dtype=jnp.bfloat16)
    target = jax.random.randint(k2, (B, 5), 1, V)

    net_out = {"encoder_out": encoder_out}
    model = FakeEncoderModel(_DummyEncoder(), net_out, target)

    # forward() passthrough
    assert model.forward() is net_out
    assert model.get_targets() is target

    # Hot path: Pallas (log_)softmax
    log_p = model.get_normalized_probs(net_out, log_probs=True)
    p = model.get_normalized_probs(net_out, log_probs=False)
    jax.block_until_ready((log_p, p))

    ref_logits = encoder_out.astype(jnp.float32)
    ref_logp = jax.nn.log_softmax(ref_logits, axis=-1)
    ref_p = jax.nn.softmax(ref_logits, axis=-1)
    assert log_p.dtype == jnp.float32 and p.dtype == jnp.float32
    assert log_p.shape == encoder_out.shape and p.shape == encoder_out.shape
    assert jnp.allclose(log_p, ref_logp, atol=1e-5, rtol=1e-5)
    assert jnp.allclose(p, ref_p, atol=1e-5, rtol=1e-5)
    assert jnp.allclose(jnp.sum(p, axis=-1), 1.0, atol=1e-5)

    # Extra coverage: non-aligned rows/vocab (partial edge blocks, no padding)
    # and the forced two-pass V-split (online logsumexp + lane masking) path.
    k3, _ = jax.random.split(k2)
    x_big = jax.random.normal(k3, (5, 8, 200), dtype=jnp.float32)  # R=40, V=200
    ref2_lp = jax.nn.log_softmax(x_big, axis=-1)
    ref2_p = jax.nn.softmax(x_big, axis=-1)

    got_lp = pallas_normalized_probs(x_big, True)
    got_p = pallas_normalized_probs(x_big, False)
    assert jnp.allclose(got_lp, ref2_lp, atol=1e-5, rtol=1e-5)
    assert jnp.allclose(got_p, ref2_p, atol=1e-5, rtol=1e-5)

    got_lp2 = pallas_normalized_probs(x_big, True, _force_v_split=True, _force_tile_v=128)
    got_p2 = pallas_normalized_probs(x_big, False, _force_v_split=True, _force_tile_v=128)
    jax.block_until_ready((got_lp2, got_p2))
    assert jnp.allclose(got_lp2, ref2_lp, atol=1e-5, rtol=1e-5)
    assert jnp.allclose(got_p2, ref2_p, atol=1e-5, rtol=1e-5)

    print("KERNEL_OK")
</pallas_src>

<mosaic_0001>
module attributes {stable_mosaic.version = 11 : i64} {
  func.func @_softmax_kernel(%arg0: i32, %arg1: memref<16x32xbf16, #tpu.memory_space<vmem>>, %arg2: memref<16x32xf32, #tpu.memory_space<vmem>>) attributes {dimension_semantics = [#tpu.dimension_semantics<parallel>], iteration_bounds = array<i64: 1>, scalar_prefetch = 0 : i64, scratch_operands = 0 : i64, tpu.core_type = #tpu.core_type<tc>, window_params = [{transform_indices = @transform_0, window_bounds = array<i64: 16, 32>}, {transform_indices = @transform_1, window_bounds = array<i64: 16, 32>}]} {
    %c0 = arith.constant 0 : index
    %c0_0 = arith.constant 0 : index
    %0 = vector.load %arg1[%c0, %c0_0] : memref<16x32xbf16, #tpu.memory_space<vmem>>, vector<16x32xbf16>
    %cst = arith.constant dense<0xFF80> : vector<16xbf16>
    %1 = vector.multi_reduction <maximumf>, %0, %cst [1] : vector<16x32xbf16> to vector<16xbf16>
    %2 = vector.shape_cast %1 : vector<16xbf16> to vector<16x1xbf16>
    %3 = arith.extf %2 : vector<16x1xbf16> to vector<16x1xf32>
    %4 = arith.extf %0 : vector<16x32xbf16> to vector<16x32xf32>
    %5 = vector.broadcast %3 : vector<16x1xf32> to vector<16x32xf32>
    %6 = arith.subf %4, %5 : vector<16x32xf32>
    %7 = math.exp %6 : vector<16x32xf32>
    %cst_1 = arith.constant dense<0.000000e+00> : vector<16xf32>
    %8 = vector.multi_reduction <add>, %7, %cst_1 [1] : vector<16x32xf32> to vector<16xf32>
    %9 = vector.shape_cast %8 : vector<16xf32> to vector<16x1xf32>
    %10 = math.log %9 : vector<16x1xf32>
    %11 = vector.broadcast %10 : vector<16x1xf32> to vector<16x32xf32>
    %12 = arith.subf %6, %11 : vector<16x32xf32>
    %c0_2 = arith.constant 0 : index
    %c0_3 = arith.constant 0 : index
    %13 = vector.load %arg2[%c0_2, %c0_3] : memref<16x32xf32, #tpu.memory_space<vmem>>, vector<16x32xf32>
    tpu.vector_store %arg2[%c0_2, %c0_3], %12 {strides = array<i32>} : memref<16x32xf32, #tpu.memory_space<vmem>>, vector<16x32xf32>,
    return
  }
  func.func @transform_0(%arg0: i32) -> (i32, i32) {
    %c0_i32 = arith.constant 0 : i32
    %c0_i32_0 = arith.constant 0 : i32
    return %arg0, %c0_i32 : i32, i32
  }
  func.func @transform_1(%arg0: i32) -> (i32, i32) {
    %c0_i32 = arith.constant 0 : i32
    %c0_i32_0 = arith.constant 0 : i32
    return %arg0, %c0_i32 : i32, i32
  }
}

</mosaic_0001>

<bundles_post_ra>
// kernel: tpu_custom_call.1
= control target key start
LH: loop header
LB: loop body
LE: loop exit
PB: predicated region body
PF: predicated region fallthrough
CT: control target
= control target key end

     0   :  { %6 = vsyncpa [#allocation3], 0  ;;  %s177_s0 = inlined_call_operand.hbm [shape: bf16[16,32], index: 0, kind: input, shape index: {}]   ;;  %s178_s1 = inlined_call_operand.hbm [shape: f32[16,32], index: 1, kind: output, shape index: {}]  }
   0x1   :  { %7 = vsyncpa [#allocation4], 0  ;;  %s12_s8 = sshll.u32 %s177_s0, 4  ;;  %s149_s9 = smov [#allocation2]   ;;  %s13_s8 = int_to_ptr.hbm [resolvable:$true] %s12_s8 }
   0x2   :  { %s14_s10 = sshll.u32 %s149_s9, 4  ;;  %s150_s11 = smov 64   ;;  %s15_s10 = int_to_ptr.vmem [resolvable:$true] %s14_s10 }
   0x3   :  { %s151_s12 = smov 4  }
   0x4   :  { %20 = dma.hbm_to_vmem [thread:$0]  %s13_s8, 128, %s15_s10, [#allocation3], %s150_s11, %s150_s11, %s151_s12  }
   0x5   :  { %145 = dma.done.wait [#allocation3], 128  }
   0x6   :  { %146 = vsyncadd [#allocation3], 4294967168  ;;  %v80_v0 = vld [vmem:[#allocation2] sm:$0xff]   ;;  %vm29_vm0 = vcmask 261120   ;;  %s152_s0 = smov [#allocation5]   ;;  %s66_s16 = sshll.u32 %s178_s1, 4  ;;  %s67_s16 = int_to_ptr.hbm [resolvable:$true] %s66_s16 }
   0x7   :  { %v81_v1 = vunpack.c.l.bf16 %v80_v0  ;;  %v82_v3 = vunpack.c.h.bf16 %v80_v0  ;;  %s64_s13 = sshll.u32 %s152_s0, 4  ;;  %s153_s17 = smov 128   ;;  %s65_s13 = int_to_ptr.vmem [resolvable:$true] %s64_s13 }
   0x8   :  { %s154_s18 = smov 8  }
   0x9   :  { %v30_v2 = vsel %vm29_vm0, %v81_v1, -inf  ;;  %v33_v4 = vsel %vm29_vm0, %v82_v3, -inf }
   0xa   :  { %31 = vmax.xlane.f32.xlu0 %v30_v2 }
  0x12   :  { %34 = vmax.xlane.f32.xlu0 %v33_v4 }
  0x7d   :  { %v32_v5 = vpop.xlane.xlu0 %31 }
  0x7e   :  { %v36_v6 = vpack.c.bf16 %v32_v5, %v32_v5 }
  0x80   :  { %v38_v7 = vunpack.c.l.bf16 %v36_v6 }
  0x82   :  { %v40_v8 = vsub.f32 %v81_v1, %v38_v7 }
  0x84   :  { %v42_v9 = vmul.f32 1.442695, %v40_v8 }
  0x85   :  { %v35_v10 = vpop.xlane.xlu0 %34 }
  0x86   :  { %89 = vpow2.f32 %v42_v9  ;;  %v37_v11 = vpack.c.bf16 %v35_v10, %v35_v10 }
  0x88   :  { %v39_v12 = vunpack.c.l.bf16 %v37_v11 }
  0x8a   :  { %v41_v13 = vsub.f32 %v82_v3, %v39_v12 }
  0x8c   :  { %v90_v14 = vpop.eup %89  ;;  %v44_v15 = vmul.f32 1.442695, %v41_v13 }
  0x8d   :  { %v46_v16 = vsel %vm29_vm0, %v90_v14, 0.0 }
  0x8e   :  { %91 = vpow2.f32 %v44_v15  ;;  %47 = vadd.xlane.f32.xlu1 %v46_v16 }
  0x94   :  { %v92_v17 = vpop.eup %91 }
  0x95   :  { %v49_v18 = vsel %vm29_vm0, %v92_v17, 0.0 }
  0x96   :  { %50 = vadd.xlane.f32.xlu1 %v49_v18 }
 0x101   :  { %v48_v19 = vpop.xlane.xlu1 %47 }
 0x102   :  { %93 = vlog2.f32 %v48_v19 }
 0x108   :  { %v94_v20 = vpop.eup %93 }
 0x109   :  { %v53_v21 = vmul.f32 0.6931472, %v94_v20  ;;  %v51_v22 = vpop.xlane.xlu1 %50 }
 0x10a   :  { %95 = vlog2.f32 %v51_v22 }
 0x10b   :  { %v56_v23 = vsub.f32 %v40_v8, %v53_v21 }
 0x10d   :  { %58 = vst.msk [vmem:[#allocation5] sm:$0xff] %vm29_vm0, %v56_v23 }
 0x110   :  { %v96_v24 = vpop.eup %95 }
 0x111   :  { %v55_v25 = vmul.f32 0.6931472, %v96_v24 }
 0x113   :  { %v57_v26 = vsub.f32 %v41_v13, %v55_v25 }
 0x115   :  { %59 = vst.msk [vmem:[#allocation5 + $0x8] sm:$0xff] %vm29_vm0, %v57_v26 }
 0x116   :  { %72 = dma.vmem_to_hbm [thread:$0]  %s65_s13, 256, %s67_s16, [#allocation4], %s153_s17, %s153_s17, %s154_s18  }
 0x117   :  { %147 = dma.done.wait [#allocation4], 256  }
 0x118   :  { %148 = vsyncadd [#allocation4], 4294967040 }
 0x119   :  { %77 = vsyncpa [#allocation3], 1 }
 0x11a   :  { %78 = vsyncpa [#allocation4], 1 }

</bundles_post_ra>
